<compile_context>
chip_gen: v7x
topology: tpu7x:2x2x1
jax: 0.10.0
libtpu: 0.0.40
codegen_flags: <defaults>
</compile_context>

<pallas_src>
import functools

import jax
import jax.numpy as jnp
import numpy as np
from jax import lax
from jax.experimental import pallas as pl
from jax.experimental.pallas import tpu as pltpu

BN_EPS = 1e-5  # torch.nn.BatchNorm1d default eps
_VMEM = pltpu.MemorySpace.VMEM


# ----------------------------------------------------------------------------
# Kernels
# ----------------------------------------------------------------------------
def _bn_sigmoid_gate(gates, xcols, gamma, beta, out_dtype):
    """Training-mode BatchNorm1d (batch stats, biased variance) -> affine ->
    sigmoid -> elementwise gate.  All math in f32."""
    b = gates.shape[0]
    inv_b = jnp.float32(1.0 / b)
    # Two-pass (centered) variance: the tile is already resident, and this is
    # far more robust to cancellation than E[x^2] - E[x]^2.
    mean = jnp.sum(gates, axis=0, keepdims=True) * inv_b          # (1, TN)
    centered = gates - mean
    var = jnp.sum(centered * centered, axis=0, keepdims=True) * inv_b
    g = centered * lax.rsqrt(var + BN_EPS)
    g = g * gamma + beta                                          # (1, TN) broadcast
    g = jax.nn.sigmoid(g)                                         # EUP
    return (xcols.astype(jnp.float32) * g).astype(out_dtype)


def _gate_kernel_single(x_ref, w_ref, gamma_ref, beta_ref, o_ref):
    """Grid-less path: the whole problem is resident in VMEM."""
    x = x_ref[...]
    gates = jnp.dot(x, w_ref[...], preferred_element_type=jnp.float32)   # (B, D)
    o_ref[...] = _bn_sigmoid_gate(gates, x, gamma_ref[...], beta_ref[...], o_ref.dtype)


def _gate_kernel_tiled(x_ref, w_ref, gamma_ref, beta_ref, o_ref):
    """N-tiled path: x fully resident, weights streamed in (D, TN) column slabs.
    BN is per-feature, so column slabs are fully independent."""
    tn = o_ref.shape[1]
    j = pl.program_id(0)
    # MXU matmul in the native input dtype; accumulate in f32.
    gates = jnp.dot(x_ref[...], w_ref[...], preferred_element_type=jnp.float32)  # (B, TN)
    # Matching x columns for the epilogue multiply: a lane-aligned view of the
    # resident x block (TN is a multiple of 128) instead of a second HBM stream.
    col0 = pl.multiple_of(j * tn, 128)
    xcols = x_ref[:, pl.ds(col0, tn)]
    o_ref[...] = _bn_sigmoid_gate(gates, xcols, gamma_ref[...], beta_ref[...], o_ref.dtype)


# ----------------------------------------------------------------------------
# VMEM planning
# ----------------------------------------------------------------------------
def _physical_vmem_bytes():
    """Per-core physical VMEM; falls back to the smallest current part (v7x)."""
    try:
        return int(pltpu.get_tpu_info().vmem_capacity_bytes)
    except Exception:
        return 64 << 20


def _plan_bytes_single(b, d, x_item, w_item, out_item):
    return b * d * x_item + d * d * w_item + b * d * out_item + 2 * d * 4


def _plan_bytes_tiled(b, d, tn, x_item, w_item, out_item, w_bufs):
    return (b * d * x_item                 # resident x (single-buffered)
            + w_bufs * d * tn * w_item     # weight slabs (pipelined)
            + 2 * b * tn * out_item        # out slabs (double-buffered)
            + 2 * 2 * tn * 4)              # gamma / beta slabs


def _pick_tn(b, d, x_item, w_item, out_item, budget, max_tn, w_bufs):
    """Largest TN (multiple of 128, divisor of D, <= max_tn) whose tiled plan
    fits `budget`.  Returns None when the whole problem fits single-shot (or D
    is not 128-divisible, falling back to single-shot)."""
    if _plan_bytes_single(b, d, x_item, w_item, out_item) <= budget:
        return None
    if d % 128 != 0 or d < 128:
        return None
    cands = [t for t in range(128, min(d, max_tn) + 1, 128) if d % t == 0]
    if w_item == 2:
        # bf16 weights: prefer N extents matching the 2x256x256 MXU tile.
        c256 = [t for t in cands if t % 256 == 0]
        cands = c256 or cands
    if not cands:
        return None
    fitting = [t for t in cands
               if _plan_bytes_tiled(b, d, t, x_item, w_item, out_item, w_bufs) <= budget]
    return max(fitting) if fitting else min(cands)


def _vmem_limit_bytes(plan_bytes, phys_bytes):
    """Plan + headroom for compiler scratch/semaphores, never below 32 MiB and
    never above physical VMEM minus margin."""
    want = max(32 << 20, plan_bytes + (8 << 20))
    return int(min(want, phys_bytes - (8 << 20)))


# ----------------------------------------------------------------------------
# Wrapper
# ----------------------------------------------------------------------------
@functools.partial(jax.jit, static_argnames=("max_tn", "force_tn"))
def gate_forward(x, gating_weights, bn_gamma, bn_beta, *, max_tn=1024, force_tn=None):
    """Gate forward (add_batch_norm=True path).

    x: (B, D); gating_weights: (D, D); bn_gamma/bn_beta: (1, D) float32.
    `force_tn` forces the N-tiled path with that tile width (testing/tuning).
    """
    B, dim = x.shape
    x_item = jnp.dtype(x.dtype).itemsize
    w_item = jnp.dtype(gating_weights.dtype).itemsize
    out_item = x_item

    cost = pl.CostEstimate(
        flops=2 * B * dim * dim,
        transcendentals=B * dim,                       # sigmoid exp
        bytes_accessed=(x_item * B * dim               # x read exactly once
                        + w_item * dim * dim           # weights
                        + out_item * B * dim           # output
                        + 2 * 4 * dim),                # gamma + beta
    )

    phys = _physical_vmem_bytes()
    budget = int(phys * 0.6)                           # leave room for buffers/scratch
    # Deeper weight buffering when per-step MXU work is tiny (small batch): the
    # weight DMA is the critical path, so smooth its issue/complete jitter.
    w_bufs = 3 if B <= 128 else 2

    tn = force_tn if force_tn is not None else _pick_tn(
        B, dim, x_item, w_item, out_item, budget, max_tn, w_bufs)

    if tn is None:
        # Single shot: everything fits in VMEM -> no grid, no per-step overhead.
        plan = _plan_bytes_single(B, dim, x_item, w_item, out_item)
        return pl.pallas_call(
            _gate_kernel_single,
            out_shape=jax.ShapeDtypeStruct((B, dim), x.dtype),
            in_specs=[pl.BlockSpec(memory_space=_VMEM)] * 4,
            out_specs=pl.BlockSpec(memory_space=_VMEM),
            compiler_params=pltpu.CompilerParams(
                vmem_limit_bytes=_vmem_limit_bytes(plan, phys)),
            cost_estimate=cost,
        )(x, gating_weights, bn_gamma, bn_beta)

    if dim % tn != 0 or tn % 128 != 0:
        raise ValueError(f"tile width tn={tn} must be a multiple of 128 dividing dim={dim}")

    plan = _plan_bytes_tiled(B, dim, tn, x_item, w_item, out_item, w_bufs)

    return pl.pallas_call(
        _gate_kernel_tiled,
        out_shape=jax.ShapeDtypeStruct((B, dim), x.dtype),
        grid=(dim // tn,),
        in_specs=[
            # Full x stays resident across the whole grid (constant block index);
            # single-buffered — there is nothing to double-buffer.
            pl.BlockSpec((B, dim), lambda j: (0, 0),
                         memory_space=_VMEM, pipeline_mode=pl.Buffered(1)),
            # Weight column slab: the dominant HBM stream, pipelined over the grid.
            pl.BlockSpec((dim, tn), lambda j: (0, j),
                         memory_space=_VMEM, pipeline_mode=pl.Buffered(w_bufs)),
            pl.BlockSpec((1, tn), lambda j: (0, j), memory_space=_VMEM),
            pl.BlockSpec((1, tn), lambda j: (0, j), memory_space=_VMEM),
        ],
        out_specs=pl.BlockSpec((B, tn), lambda j: (0, j), memory_space=_VMEM),
        compiler_params=pltpu.CompilerParams(
            dimension_semantics=("parallel",),     # v7x: shard N-tiles across cores
            vmem_limit_bytes=_vmem_limit_bytes(plan, phys),
        ),
        cost_estimate=cost,
    )(x, gating_weights, bn_gamma, bn_beta)


def gate_forward_ref(x, gating_weights, bn_gamma, bn_beta):
    """Pure-JAX reference mirroring the PyTorch forward (training-mode BN)."""
    gates = x @ gating_weights
    mean = jnp.mean(gates, axis=0, keepdims=True)
    var = jnp.mean((gates - mean) ** 2, axis=0, keepdims=True)
    gates = (gates - mean) / jnp.sqrt(var + BN_EPS)
    gates = gates * bn_gamma + bn_beta
    gates = jax.nn.sigmoid(gates)
    return x * gates


if __name__ == "__main__":
    B, dim = 8, 512

    key = jax.random.PRNGKey(0)
    k_x, k_w, k_g, k_b = jax.random.split(key, 4)

    x = jax.random.normal(k_x, (B, dim), dtype=jnp.float32)
    # nn.Parameter(torch.randn(dim, dim) * 1/sqrt(dim))
    gating_weights = jax.random.normal(k_w, (dim, dim), dtype=jnp.float32) / jnp.sqrt(
        jnp.float32(dim)
    )
    # BatchNorm1d affine params (non-trivial to exercise the path).
    bn_gamma = 1.0 + 0.1 * jax.random.normal(k_g, (1, dim), dtype=jnp.float32)
    bn_beta = 0.1 * jax.random.normal(k_b, (1, dim), dtype=jnp.float32)

    ref = gate_forward_ref(x, gating_weights, bn_gamma, bn_beta)

    # Default path: at this size everything fits in VMEM -> grid-less single shot.
    out = jax.block_until_ready(gate_forward(x, gating_weights, bn_gamma, bn_beta))
    np.testing.assert_allclose(np.asarray(out), np.asarray(ref), rtol=1e-4, atol=1e-5)

    # Also exercise the N-tiled, pipelined path (what a large D would use).
    out_tiled = jax.block_until_ready(
        gate_forward(x, gating_weights, bn_gamma, bn_beta, force_tn=128))
    np.testing.assert_allclose(np.asarray(out_tiled), np.asarray(ref), rtol=1e-4, atol=1e-5)

    print("KERNEL_OK")
</pallas_src>

<mosaic_0001>
module attributes {stable_mosaic.version = 11 : i64} {
  func.func @_gate_kernel_single(%arg0: memref<8x512xf32, #tpu.memory_space<vmem>>, %arg1: memref<512x512xf32, #tpu.memory_space<vmem>>, %arg2: memref<1x512xf32, #tpu.memory_space<vmem>>, %arg3: memref<1x512xf32, #tpu.memory_space<vmem>>, %arg4: memref<8x512xf32, #tpu.memory_space<vmem>>) attributes {dimension_semantics = [], scalar_prefetch = 0 : i64, scratch_operands = 0 : i64, tpu.core_type = #tpu.core_type<tc>} {
    %c0 = arith.constant 0 : index
    %c0_0 = arith.constant 0 : index
    %0 = vector.load %arg0[%c0, %c0_0] : memref<8x512xf32, #tpu.memory_space<vmem>>, vector<8x512xf32>
    %c0_1 = arith.constant 0 : index
    %c0_2 = arith.constant 0 : index
    %1 = vector.load %arg1[%c0_1, %c0_2] : memref<512x512xf32, #tpu.memory_space<vmem>>, vector<512x512xf32>
    %cst = arith.constant dense<0.000000e+00> : vector<8x512xf32>
    %2 = tpu.matmul %0, %1, %cst {dimension_numbers = #tpu.dot_dimension_numbers<[1], [0], [0], [1], [0, 0, 1, 1], [], []>} : vector<8x512xf32>, vector<512x512xf32>, vector<8x512xf32> -> vector<8x512xf32>
    %c0_3 = arith.constant 0 : index
    %c0_4 = arith.constant 0 : index
    %3 = vector.load %arg2[%c0_3, %c0_4] : memref<1x512xf32, #tpu.memory_space<vmem>>, vector<1x512xf32>
    %c0_5 = arith.constant 0 : index
    %c0_6 = arith.constant 0 : index
    %4 = vector.load %arg3[%c0_5, %c0_6] : memref<1x512xf32, #tpu.memory_space<vmem>>, vector<1x512xf32>
    %cst_7 = arith.constant dense<0.000000e+00> : vector<512xf32>
    %5 = vector.multi_reduction <add>, %2, %cst_7 [0] : vector<8x512xf32> to vector<512xf32>
    %6 = vector.shape_cast %5 : vector<512xf32> to vector<1x512xf32>
    %cst_8 = arith.constant 1.250000e-01 : f32
    %7 = vector.broadcast %cst_8 : f32 to vector<1x512xf32>
    %8 = arith.mulf %6, %7 : vector<1x512xf32>
    %9 = vector.broadcast %8 : vector<1x512xf32> to vector<8x512xf32>
    %10 = arith.subf %2, %9 : vector<8x512xf32>
    %11 = arith.mulf %10, %10 : vector<8x512xf32>
    %cst_9 = arith.constant dense<0.000000e+00> : vector<512xf32>
    %12 = vector.multi_reduction <add>, %11, %cst_9 [0] : vector<8x512xf32> to vector<512xf32>
    %13 = vector.shape_cast %12 : vector<512xf32> to vector<1x512xf32>
    %cst_10 = arith.constant 1.250000e-01 : f32
    %14 = vector.broadcast %cst_10 : f32 to vector<1x512xf32>
    %15 = arith.mulf %13, %14 : vector<1x512xf32>
    %cst_11 = arith.constant 9.99999974E-6 : f32
    %16 = vector.broadcast %cst_11 : f32 to vector<1x512xf32>
    %17 = arith.addf %15, %16 : vector<1x512xf32>
    %18 = math.rsqrt %17 : vector<1x512xf32>
    %19 = vector.broadcast %18 : vector<1x512xf32> to vector<8x512xf32>
    %20 = arith.mulf %10, %19 : vector<8x512xf32>
    %21 = vector.broadcast %3 : vector<1x512xf32> to vector<8x512xf32>
    %22 = arith.mulf %20, %21 : vector<8x512xf32>
    %23 = vector.broadcast %4 : vector<1x512xf32> to vector<8x512xf32>
    %24 = arith.addf %22, %23 : vector<8x512xf32>
    %25 = arith.negf %24 : vector<8x512xf32>
    %26 = math.exp %25 : vector<8x512xf32>
    %cst_12 = arith.constant 1.000000e+00 : f32
    %27 = vector.broadcast %cst_12 : f32 to vector<8x512xf32>
    %28 = arith.addf %27, %26 : vector<8x512xf32>
    %29 = arith.divf %27, %28 : vector<8x512xf32>
    %30 = arith.mulf %0, %29 : vector<8x512xf32>
    %c0_13 = arith.constant 0 : index
    %c0_14 = arith.constant 0 : index
    %31 = vector.load %arg4[%c0_13, %c0_14] : memref<8x512xf32, #tpu.memory_space<vmem>>, vector<8x512xf32>
    tpu.vector_store %arg4[%c0_13, %c0_14], %30 {strides = array<i32>} : memref<8x512xf32, #tpu.memory_space<vmem>>, vector<8x512xf32>,
    return
  }
}

</mosaic_0001>

<bundles_post_ra>
// kernel: gate_forward.1
= control target key start
LH: loop header
LB: loop body
LE: loop exit
PB: predicated region body
PF: predicated region fallthrough
CT: control target
= control target key end

     0   :  { %9 = vsyncpa [#allocation3], 0  ;;  %s1238_s0 = inlined_call_operand.hbm [shape: f32[8,512], index: 0, kind: input, shape index: {}]   ;;  %s1239_s1 = inlined_call_operand.hbm [shape: f32[512,512], index: 1, kind: input, shape index: {}]   ;;  %s1240_s2 = inlined_call_operand.vmem [shape: f32[1,512], index: 2, kind: input, shape index: {}]   ;;  %s1241_s3 = inlined_call_operand.vmem [shape: f32[1,512], index: 3, kind: input, shape index: {}]   ;;  %s1242_s4 = inlined_call_operand.hbm [shape: f32[8,512], index: 4, kind: output, shape index: {}]  }
   0x1   :  { %10 = vsyncpa [#allocation6], 0 }
   0x2   :  { %11 = vsyncpa [#allocation4], 0  ;;  %s1129_s15 = smov [#allocation2]   ;;  %s1130_s17 = smov [#allocation5]  }
   0x3   :  { %s18_s16 = sshll.u32 %s1129_s15, 4  ;;  %s27_s18 = sshll.u32 %s1130_s17, 4  ;;  %s19_s16 = int_to_ptr.vmem [resolvable:$true] %s18_s16  ;;  %s1159_s18 = int_to_ptr.vmem [resolvable:$true] %s27_s18 }
   0x4   :  { %s1057_s21 = scalar_lea.hbm %s1238_s0, 512 }
   0x5   :  { %p1058_p0 = scmp.ne.s32.totalorder %s1238_s0, %s1057_s21  ;;  %p1061_p1 = scmp.lt.u32.totalorder %s1057_s21, %s1238_s0 }
   0x7   :  { %p1063_p2 = pnand %p1061_p1, %p1058_p0 }
   0x9   :  { %1066 = shalt.err (!%p1063_p2)
}
   0xa   :  { %s1067_s26 = scalar_lea.vmem %s19_s16, 512  ;;  %p1072_p4 = scmp.lt.s32.totalorder %s19_s16, %s19_s16 }
   0xb   :  { %p1068_p3 = scmp.ne.s32.totalorder %s19_s16, %s1067_s26  ;;  %p1073_p5 = scmp.lt.s32.totalorder %s1067_s26, %s1067_s26 }
   0xd   :  { %p1074_p6 = por %p1073_p5, %p1072_p4 }
   0xf   :  { %p1075_p7 = pnand %p1074_p6, %p1068_p3 }
  0x11   :  { %1078 = shalt.err (!%p1075_p7)
}
  0x12   :  { %21 = dma.hbm_to_vmem [thread:$0]  %s1238_s0, 512, %s19_s16, [#allocation3]  }
  0x13   :  { %s1079_s5 = scalar_lea.hbm %s1239_s1, 32768 }
  0x14   :  { %p1080_p8 = scmp.ne.s32.totalorder %s1239_s1, %s1079_s5  ;;  %p1083_p9 = scmp.lt.u32.totalorder %s1079_s5, %s1239_s1 }
  0x16   :  { %p1085_p10 = pnand %p1083_p9, %p1080_p8 }
  0x18   :  { %1088 = shalt.err (!%p1085_p10)
}
  0x19   :  { %s1089_s10 = scalar_lea.vmem %s1159_s18, 32768  ;;  %p1094_p12 = scmp.lt.s32.totalorder %s1159_s18, %s1159_s18 }
  0x1a   :  { %p1090_p11 = scmp.ne.s32.totalorder %s1159_s18, %s1089_s10  ;;  %p1095_p13 = scmp.lt.s32.totalorder %s1089_s10, %s1089_s10 }
  0x1c   :  { %p1096_p0 = por %p1095_p13, %p1094_p12 }
  0x1e   :  { %p1097_p1 = pnand %p1096_p0, %p1090_p11 }
  0x20   :  { %1100 = shalt.err (!%p1097_p1)
}
  0x21   :  { %s1131_s0 = smov 512   ;;  %s1132_s11 = smov 32  }
  0x22   :  { %33 = dma.hbm_to_vmem [thread:$0]  %s1239_s1, 32768, %s1159_s18, [#allocation6], %s1131_s0, %s1131_s0, %s1132_s11  }
  0x23   :  { %1123 = dma.done.wait [#allocation3], 512  }
  0x24   :  { %1124 = vsyncadd [#allocation3], 4294966784 }
  0x25   :  { %1125 = dma.done.wait [#allocation6], 32768  }
  0x26   :  { %1126 = vsyncadd [#allocation6], 4294934528  ;;  %v49_v0 = vld [vmem:[#allocation5 + $0x8] sm:$0xff]  ;;  %v51_v2 = vld [vmem:[#allocation5 + $0x18] sm:$0xff] }
  0x27   :  { %v53_v1 = vld [vmem:[#allocation5 + $0x28] sm:$0xff]  ;;  %v55_v4 = vld [vmem:[#allocation5 + $0x38] sm:$0xff]  ;;  %v48_v5 = vld [vmem:[#allocation5] sm:$0xff] }
  0x28   :  { %v768_v3 = vpack.c.bf16 %v53_v1, %v49_v0  ;;  %v52_v6 = vld [vmem:[#allocation5 + $0x20] sm:$0xff]  ;;  %v896_v7 = vpack.c.bf16 %v55_v4, %v51_v2  ;;  %v50_v9 = vld [vmem:[#allocation5 + $0x10] sm:$0xff]  ;;  %v57_v11 = vld [vmem:[#allocation5 + $0x48] sm:$0xff] }
  0x29   :  { %v770_v8 = vpack.c.bf16 %v52_v6, %v48_v5  ;;  %v54_v10 = vld [vmem:[#allocation5 + $0x30] sm:$0xff]  ;;  %v61_v13 = vld [vmem:[#allocation5 + $0x68] sm:$0xff]  ;;  %v59_v14 = vld [vmem:[#allocation5 + $0x58] sm:$0xff] }
  0x2a   :  { %769 = vmatprep.subr.bf16.mxu0 %v768_v3  ;;  %v898_v12 = vpack.c.bf16 %v54_v10, %v50_v9  ;;  %v63_v15 = vld [vmem:[#allocation5 + $0x78] sm:$0xff]  ;;  %897 = vmatprep.subr.bf16.mxu1 %v896_v7  ;;  %v772_v16 = vpack.c.bf16 %v61_v13, %v57_v11  ;;  %v56_v18 = vld [vmem:[#allocation5 + $0x40] sm:$0xff]  ;;  %v58_v20 = vld [vmem:[#allocation5 + $0x50] sm:$0xff] }
  0x2b   :  { %771 = vmatpush1.bf16.msra.mxu0 %v770_v8  ;;  %v900_v17 = vpack.c.bf16 %v63_v15, %v59_v14  ;;  %v60_v19 = vld [vmem:[#allocation5 + $0x60] sm:$0xff]  ;;  %v62_v22 = vld [vmem:[#allocation5 + $0x70] sm:$0xff]  ;;  %v65_v23 = vld [vmem:[#allocation5 + $0x88] sm:$0xff] }
  0x2c   :  { %899 = vmatpush1.bf16.msra.mxu1 %v898_v12  ;;  %v774_v21 = vpack.c.bf16 %v60_v19, %v56_v18  ;;  %v69_v24 = vld [vmem:[#allocation5 + $0xa8] sm:$0xff]  ;;  %773 = vmatprep.subr.bf16.mxu0 %v772_v16  ;;  %v902_v25 = vpack.c.bf16 %v62_v22, %v58_v20  ;;  %v67_v27 = vld [vmem:[#allocation5 + $0x98] sm:$0xff]  ;;  %v64_v29 = vld [vmem:[#allocation5 + $0x80] sm:$0xff] }
  0x2d   :  { %901 = vmatprep.subr.bf16.mxu1 %v900_v17  ;;  %v776_v26 = vpack.c.bf16 %v69_v24, %v65_v23  ;;  %v71_v28 = vld [vmem:[#allocation5 + $0xb8] sm:$0xff]  ;;  %v68_v31 = vld [vmem:[#allocation5 + $0xa0] sm:$0xff]  ;;  %v66_v32 = vld [vmem:[#allocation5 + $0x90] sm:$0xff] }
  0x2e   :  { %v904_v30 = vpack.c.bf16 %v71_v28, %v67_v27  ;;  %v70_v33 = vld [vmem:[#allocation5 + $0xb0] sm:$0xff]  ;;  %v778_v34 = vpack.c.bf16 %v68_v31, %v64_v29  ;;  %v73_v35 = vld [vmem:[#allocation5 + $0xc8] sm:$0xff]  ;;  %v75_v37 = vld [vmem:[#allocation5 + $0xd8] sm:$0xff] }
  0x2f   :  { %775 = vmatpush1.bf16.msra.mxu0 %v774_v21  ;;  %v77_v36 = vld [vmem:[#allocation5 + $0xe8] sm:$0xff]  ;;  %v906_v38 = vpack.c.bf16 %v70_v33, %v66_v32  ;;  %v79_v40 = vld [vmem:[#allocation5 + $0xf8] sm:$0xff]  ;;  %v72_v41 = vld [vmem:[#allocation5 + $0xc0] sm:$0xff] }
  0x30   :  { %903 = vmatpush1.bf16.msra.mxu1 %v902_v25  ;;  %777 = vmatprep.subr.bf16.mxu0 %v776_v26  ;;  %v780_v39 = vpack.c.bf16 %v77_v36, %v73_v35  ;;  %v76_v42 = vld [vmem:[#allocation5 + $0xe0] sm:$0xff]  ;;  %v908_v43 = vpack.c.bf16 %v79_v40, %v75_v37  ;;  %v74_v44 = vld [vmem:[#allocation5 + $0xd0] sm:$0xff]  ;;  %v81_v46 = vld [vmem:[#allocation5 + $0x108] sm:$0xff] }
  0x31   :  { %905 = vmatprep.subr.bf16.mxu1 %v904_v30  ;;  %v78_v45 = vld [vmem:[#allocation5 + $0xf0] sm:$0xff]  ;;  %v85_v47 = vld [vmem:[#allocation5 + $0x128] sm:$0xff]  ;;  %v83_v48 = vld [vmem:[#allocation5 + $0x118] sm:$0xff]  ;;  %v782_v50 = vpack.c.bf16 %v76_v42, %v72_v41 }
  0x32   :  { %v87_v49 = vld [vmem:[#allocation5 + $0x138] sm:$0xff]  ;;  %v910_v51 = vpack.c.bf16 %v78_v45, %v74_v44  ;;  %v784_v52 = vpack.c.bf16 %v85_v47, %v81_v46  ;;  %v80_v53 = vld [vmem:[#allocation5 + $0x100] sm:$0xff]  ;;  %v82_v55 = vld [vmem:[#allocation5 + $0x110] sm:$0xff] }
  0x33   :  { %779 = vmatpush1.bf16.msra.mxu0 %v778_v34  ;;  %v84_v54 = vld [vmem:[#allocation5 + $0x120] sm:$0xff]  ;;  %v912_v56 = vpack.c.bf16 %v87_v49, %v83_v48  ;;  %v86_v57 = vld [vmem:[#allocation5 + $0x130] sm:$0xff]  ;;  %v89_v58 = vld [vmem:[#allocation5 + $0x148] sm:$0xff] }
  0x34   :  { %907 = vmatpush1.bf16.msra.mxu1 %v906_v38  ;;  %781 = vmatprep.subr.bf16.mxu0 %v780_v39  ;;  %v93_v59 = vld [vmem:[#allocation5 + $0x168] sm:$0xff]  ;;  %v91_v60 = vld [vmem:[#allocation5 + $0x158] sm:$0xff]  ;;  %v786_v62 = vpack.c.bf16 %v84_v54, %v80_v53  ;;  %v914_v63 = vpack.c.bf16 %v86_v57, %v82_v55  ;;  %v88_v1 = vld [vmem:[#allocation5 + $0x140] sm:$0xff] }
  0x35   :  { %909 = vmatprep.subr.bf16.mxu1 %v908_v43  ;;  %v95_v61 = vld [vmem:[#allocation5 + $0x178] sm:$0xff]  ;;  %v788_v0 = vpack.c.bf16 %v93_v59, %v89_v58  ;;  %v92_v2 = vld [vmem:[#allocation5 + $0x160] sm:$0xff]  ;;  %v90_v3 = vld [vmem:[#allocation5 + $0x150] sm:$0xff] }
  0x36   :  { %v916_v4 = vpack.c.bf16 %v95_v61, %v91_v60  ;;  %v94_v5 = vld [vmem:[#allocation5 + $0x170] sm:$0xff]  ;;  %v97_v6 = vld [vmem:[#allocation5 + $0x188] sm:$0xff]  ;;  %v99_v8 = vld [vmem:[#allocation5 + $0x198] sm:$0xff]  ;;  %v790_v10 = vpack.c.bf16 %v92_v2, %v88_v1 }
  0x37   :  { %783 = vmatpush1.bf16.msra.mxu0 %v782_v50  ;;  %v101_v7 = vld [vmem:[#allocation5 + $0x1a8] sm:$0xff]  ;;  %v103_v9 = vld [vmem:[#allocation5 + $0x1b8] sm:$0xff]  ;;  %v918_v11 = vpack.c.bf16 %v94_v5, %v90_v3  ;;  %v96_v13 = vld [vmem:[#allocation5 + $0x180] sm:$0xff] }
  0x38   :  { %911 = vmatpush1.bf16.msra.mxu1 %v910_v51  ;;  %785 = vmatprep.subr.bf16.mxu0 %v784_v52  ;;  %v792_v12 = vpack.c.bf16 %v101_v7, %v97_v6  ;;  %v100_v14 = vld [vmem:[#allocation5 + $0x1a0] sm:$0xff]  ;;  %v98_v15 = vld [vmem:[#allocation5 + $0x190] sm:$0xff]  ;;  %v920_v16 = vpack.c.bf16 %v103_v9, %v99_v8  ;;  %v105_v18 = vld [vmem:[#allocation5 + $0x1c8] sm:$0xff] }
  0x39   :  { %913 = vmatprep.subr.bf16.mxu1 %v912_v56  ;;  %v102_v17 = vld [vmem:[#allocation5 + $0x1b0] sm:$0xff]  ;;  %v109_v19 = vld [vmem:[#allocation5 + $0x1e8] sm:$0xff]  ;;  %v107_v20 = vld [vmem:[#allocation5 + $0x1d8] sm:$0xff]  ;;  %v794_v22 = vpack.c.bf16 %v100_v14, %v96_v13 }
  0x3a   :  { %v111_v21 = vld [vmem:[#allocation5 + $0x1f8] sm:$0xff]  ;;  %v922_v23 = vpack.c.bf16 %v102_v17, %v98_v15  ;;  %v796_v24 = vpack.c.bf16 %v109_v19, %v105_v18  ;;  %v104_v25 = vld [vmem:[#allocation5 + $0x1c0] sm:$0xff]  ;;  %v106_v27 = vld [vmem:[#allocation5 + $0x1d0] sm:$0xff] }
  0x3b   :  { %787 = vmatpush1.bf16.msra.mxu0 %v786_v62  ;;  %v108_v26 = vld [vmem:[#allocation5 + $0x1e0] sm:$0xff]  ;;  %v924_v28 = vpack.c.bf16 %v111_v21, %v107_v20  ;;  %v110_v29 = vld [vmem:[#allocation5 + $0x1f0] sm:$0xff]  ;;  %v113_v30 = vld [vmem:[#allocation5 + $0x208] sm:$0xff] }
  0x3c   :  { %915 = vmatpush1.bf16.msra.mxu1 %v914_v63  ;;  %789 = vmatprep.subr.bf16.mxu0 %v788_v0  ;;  %v117_v31 = vld [vmem:[#allocation5 + $0x228] sm:$0xff]  ;;  %v115_v32 = vld [vmem:[#allocation5 + $0x218] sm:$0xff]  ;;  %v798_v34 = vpack.c.bf16 %v108_v26, %v104_v25  ;;  %v926_v35 = vpack.c.bf16 %v110_v29, %v106_v27  ;;  %v112_v37 = vld [vmem:[#allocation5 + $0x200] sm:$0xff] }
  0x3d   :  { %917 = vmatprep.subr.bf16.mxu1 %v916_v4  ;;  %v119_v33 = vld [vmem:[#allocation5 + $0x238] sm:$0xff]  ;;  %v800_v36 = vpack.c.bf16 %v117_v31, %v113_v30  ;;  %v116_v38 = vld [vmem:[#allocation5 + $0x220] sm:$0xff]  ;;  %v114_v39 = vld [vmem:[#allocation5 + $0x210] sm:$0xff] }
  0x3e   :  { %v928_v40 = vpack.c.bf16 %v119_v33, %v115_v32  ;;  %v118_v41 = vld [vmem:[#allocation5 + $0x230] sm:$0xff]  ;;  %v121_v42 = vld [vmem:[#allocation5 + $0x248] sm:$0xff]  ;;  %v123_v44 = vld [vmem:[#allocation5 + $0x258] sm:$0xff]  ;;  %v802_v46 = vpack.c.bf16 %v116_v38, %v112_v37 }
  0x3f   :  { %791 = vmatpush1.bf16.msra.mxu0 %v790_v10  ;;  %v125_v43 = vld [vmem:[#allocation5 + $0x268] sm:$0xff]  ;;  %v127_v45 = vld [vmem:[#allocation5 + $0x278] sm:$0xff]  ;;  %v930_v47 = vpack.c.bf16 %v118_v41, %v114_v39  ;;  %v120_v49 = vld [vmem:[#allocation5 + $0x240] sm:$0xff] }
  0x40   :  { %919 = vmatpush1.bf16.msra.mxu1 %v918_v11  ;;  %793 = vmatprep.subr.bf16.mxu0 %v792_v12  ;;  %v804_v48 = vpack.c.bf16 %v125_v43, %v121_v42  ;;  %v124_v50 = vld [vmem:[#allocation5 + $0x260] sm:$0xff]  ;;  %v122_v51 = vld [vmem:[#allocation5 + $0x250] sm:$0xff]  ;;  %v932_v52 = vpack.c.bf16 %v127_v45, %v123_v44  ;;  %v129_v54 = vld [vmem:[#allocation5 + $0x288] sm:$0xff] }
  0x41   :  { %921 = vmatprep.subr.bf16.mxu1 %v920_v16  ;;  %v126_v53 = vld [vmem:[#allocation5 + $0x270] sm:$0xff]  ;;  %v133_v55 = vld [vmem:[#allocation5 + $0x2a8] sm:$0xff]  ;;  %v131_v56 = vld [vmem:[#allocation5 + $0x298] sm:$0xff]  ;;  %v806_v58 = vpack.c.bf16 %v124_v50, %v120_v49 }
  0x42   :  { %v135_v57 = vld [vmem:[#allocation5 + $0x2b8] sm:$0xff]  ;;  %v934_v59 = vpack.c.bf16 %v126_v53, %v122_v51  ;;  %v808_v60 = vpack.c.bf16 %v133_v55, %v129_v54  ;;  %v128_v61 = vld [vmem:[#allocation5 + $0x280] sm:$0xff]  ;;  %v130_v63 = vld [vmem:[#allocation5 + $0x290] sm:$0xff] }
  0x43   :  { %795 = vmatpush1.bf16.msra.mxu0 %v794_v22  ;;  %v132_v62 = vld [vmem:[#allocation5 + $0x2a0] sm:$0xff]  ;;  %v936_v0 = vpack.c.bf16 %v135_v57, %v131_v56  ;;  %v134_v1 = vld [vmem:[#allocation5 + $0x2b0] sm:$0xff]  ;;  %v137_v2 = vld [vmem:[#allocation5 + $0x2c8] sm:$0xff] }
  0x44   :  { %923 = vmatpush1.bf16.msra.mxu1 %v922_v23  ;;  %797 = vmatprep.subr.bf16.mxu0 %v796_v24  ;;  %v141_v3 = vld [vmem:[#allocation5 + $0x2e8] sm:$0xff]  ;;  %v139_v4 = vld [vmem:[#allocation5 + $0x2d8] sm:$0xff]  ;;  %v810_v6 = vpack.c.bf16 %v132_v62, %v128_v61  ;;  %v136_v7 = vld [vmem:[#allocation5 + $0x2c0] sm:$0xff]  ;;  %v938_v8 = vpack.c.bf16 %v134_v1, %v130_v63 }
  0x45   :  { %925 = vmatprep.subr.bf16.mxu1 %v924_v28  ;;  %v143_v5 = vld [vmem:[#allocation5 + $0x2f8] sm:$0xff]  ;;  %v812_v9 = vpack.c.bf16 %v141_v3, %v137_v2  ;;  %v140_v10 = vld [vmem:[#allocation5 + $0x2e0] sm:$0xff]  ;;  %v138_v11 = vld [vmem:[#allocation5 + $0x2d0] sm:$0xff] }
  0x46   :  { %v142_v12 = vld [vmem:[#allocation5 + $0x2f0] sm:$0xff]  ;;  %v940_v13 = vpack.c.bf16 %v143_v5, %v139_v4  ;;  %v145_v14 = vld [vmem:[#allocation5 + $0x308] sm:$0xff]  ;;  %v147_v17 = vld [vmem:[#allocation5 + $0x318] sm:$0xff]  ;;  %v814_v19 = vpack.c.bf16 %v140_v10, %v136_v7 }
  0x47   :  { %799 = vmatpush1.bf16.msra.mxu0 %v798_v34  ;;  %v149_v15 = vld [vmem:[#allocation5 + $0x328] sm:$0xff]  ;;  %v151_v18 = vld [vmem:[#allocation5 + $0x338] sm:$0xff]  ;;  %v942_v20 = vpack.c.bf16 %v142_v12, %v138_v11  ;;  %v144_v22 = vld [vmem:[#allocation5 + $0x300] sm:$0xff] }
  0x48   :  { %927 = vmatpush1.bf16.msra.mxu1 %v926_v35  ;;  %801 = vmatprep.subr.bf16.mxu0 %v800_v36  ;;  %v1190_v16 = vld [vmem:[#allocation2 + $0x8] sm:$0xff]  ;;  %v816_v21 = vpack.c.bf16 %v149_v15, %v145_v14  ;;  %v148_v23 = vld [vmem:[#allocation5 + $0x320] sm:$0xff]  ;;  %v146_v24 = vld [vmem:[#allocation5 + $0x310] sm:$0xff]  ;;  %v944_v25 = vpack.c.bf16 %v151_v18, %v147_v17 }
  0x49   :  { %929 = vmatprep.subr.bf16.mxu1 %v928_v40  ;;  %368 = vmatprep.mubr.f32.mxu0 %v1190_v16  ;;  %v150_v26 = vld [vmem:[#allocation5 + $0x330] sm:$0xff]  ;;  %v153_v27 = vld [vmem:[#allocation5 + $0x348] sm:$0xff]  ;;  %v155_v29 = vld [vmem:[#allocation5 + $0x358] sm:$0xff]  ;;  %v818_v31 = vpack.c.bf16 %v148_v23, %v144_v22 }
  0x4a   :  { %510 = vmatprep.mubr.f32.mxu1 %v1190_v16  ;;  %v157_v28 = vld [vmem:[#allocation5 + $0x368] sm:$0xff]  ;;  %v159_v30 = vld [vmem:[#allocation5 + $0x378] sm:$0xff]  ;;  %v946_v32 = vpack.c.bf16 %v150_v26, %v146_v24  ;;  %v152_v34 = vld [vmem:[#allocation5 + $0x340] sm:$0xff] }
  0x4b   :  { %803 = vmatpush1.bf16.msra.mxu0 %v802_v46  ;;  %v820_v33 = vpack.c.bf16 %v157_v28, %v153_v27  ;;  %v156_v35 = vld [vmem:[#allocation5 + $0x360] sm:$0xff]  ;;  %v154_v36 = vld [vmem:[#allocation5 + $0x350] sm:$0xff]  ;;  %v948_v37 = vpack.c.bf16 %v159_v30, %v155_v29  ;;  %v161_v39 = vld [vmem:[#allocation5 + $0x388] sm:$0xff] }
  0x4c   :  { %931 = vmatpush1.bf16.msra.mxu1 %v930_v47  ;;  %805 = vmatprep.subr.bf16.mxu0 %v804_v48  ;;  %v158_v38 = vld [vmem:[#allocation5 + $0x370] sm:$0xff]  ;;  %v165_v40 = vld [vmem:[#allocation5 + $0x3a8] sm:$0xff]  ;;  %v163_v41 = vld [vmem:[#allocation5 + $0x398] sm:$0xff]  ;;  %v822_v43 = vpack.c.bf16 %v156_v35, %v152_v34 }
  0x4d   :  { %933 = vmatprep.subr.bf16.mxu1 %v932_v52  ;;  %v167_v42 = vld [vmem:[#allocation5 + $0x3b8] sm:$0xff]  ;;  %v950_v44 = vpack.c.bf16 %v158_v38, %v154_v36  ;;  %v824_v45 = vpack.c.bf16 %v165_v40, %v161_v39  ;;  %v160_v46 = vld [vmem:[#allocation5 + $0x380] sm:$0xff]  ;;  %v162_v48 = vld [vmem:[#allocation5 + $0x390] sm:$0xff] }
  0x4e   :  { %v164_v47 = vld [vmem:[#allocation5 + $0x3a0] sm:$0xff]  ;;  %v952_v49 = vpack.c.bf16 %v167_v42, %v163_v41  ;;  %v166_v50 = vld [vmem:[#allocation5 + $0x3b0] sm:$0xff]  ;;  %v169_v51 = vld [vmem:[#allocation5 + $0x3c8] sm:$0xff] }
  0x4f   :  { %807 = vmatpush1.bf16.msra.mxu0 %v806_v58  ;;  %v173_v52 = vld [vmem:[#allocation5 + $0x3e8] sm:$0xff]  ;;  %v171_v53 = vld [vmem:[#allocation5 + $0x3d8] sm:$0xff]  ;;  %v826_v55 = vpack.c.bf16 %v164_v47, %v160_v46  ;;  %v954_v56 = vpack.c.bf16 %v166_v50, %v162_v48  ;;  %v168_v58 = vld [vmem:[#allocation5 + $0x3c0] sm:$0xff] }
  0x50   :  { %935 = vmatpush1.bf16.msra.mxu1 %v934_v59  ;;  %809 = vmatprep.subr.bf16.mxu0 %v808_v60  ;;  %v175_v54 = vld [vmem:[#allocation5 + $0x3f8] sm:$0xff]  ;;  %v828_v57 = vpack.c.bf16 %v173_v52, %v169_v51  ;;  %v172_v59 = vld [vmem:[#allocation5 + $0x3e0] sm:$0xff]  ;;  %v170_v60 = vld [vmem:[#allocation5 + $0x3d0] sm:$0xff] }
  0x51   :  { %937 = vmatprep.subr.bf16.mxu1 %v936_v0  ;;  %v956_v61 = vpack.c.bf16 %v175_v54, %v171_v53  ;;  %v174_v62 = vld [vmem:[#allocation5 + $0x3f0] sm:$0xff]  ;;  %v177_v63 = vld [vmem:[#allocation5 + $0x408] sm:$0xff]  ;;  %v179_v1 = vld [vmem:[#allocation5 + $0x418] sm:$0xff]  ;;  %v830_v3 = vpack.c.bf16 %v172_v59, %v168_v58 }
  0x52   :  { %v181_v0 = vld [vmem:[#allocation5 + $0x428] sm:$0xff]  ;;  %v183_v2 = vld [vmem:[#allocation5 + $0x438] sm:$0xff]  ;;  %v958_v4 = vpack.c.bf16 %v174_v62, %v170_v60  ;;  %v180_v7 = vld [vmem:[#allocation5 + $0x420] sm:$0xff] }
  0x53   :  { %811 = vmatpush1.bf16.msra.mxu0 %v810_v6  ;;  %v832_v5 = vpack.c.bf16 %v181_v0, %v177_v63  ;;  %v176_v6 = vld [vmem:[#allocation5 + $0x400] sm:$0xff]  ;;  %v182_v10 = vld [vmem:[#allocation5 + $0x430] sm:$0xff]  ;;  %v185_v11 = vld [vmem:[#allocation5 + $0x448] sm:$0xff] }
  0x54   :  { %939 = vmatpush1.bf16.msra.mxu1 %v938_v8  ;;  %813 = vmatprep.subr.bf16.mxu0 %v812_v9  ;;  %v178_v8 = vld [vmem:[#allocation5 + $0x410] sm:$0xff]  ;;  %v960_v9 = vpack.c.bf16 %v183_v2, %v179_v1  ;;  %v189_v12 = vld [vmem:[#allocation5 + $0x468] sm:$0xff]  ;;  %v191_v14 = vld [vmem:[#allocation5 + $0x478] sm:$0xff]  ;;  %v834_v17 = vpack.c.bf16 %v180_v7, %v176_v6 }
  0x55   :  { %941 = vmatprep.subr.bf16.mxu1 %v940_v13  ;;  %v187_v13 = vld [vmem:[#allocation5 + $0x458] sm:$0xff]  ;;  %v1194_v15 = vld [vmem:[#allocation2] sm:$0xff]  ;;  %v962_v18 = vpack.c.bf16 %v182_v10, %v178_v8  ;;  %v186_v22 = vld [vmem:[#allocation5 + $0x450] sm:$0xff] }
  0x56   :  { %v964_v23 = vpack.c.bf16 %v191_v14, %v187_v13  ;;  %v190_v24 = vld [vmem:[#allocation5 + $0x470] sm:$0xff]  ;;  %v197_v26 = vld [vmem:[#allocation5 + $0x4a8] sm:$0xff]  ;;  %v195_v27 = vld [vmem:[#allocation5 + $0x498] sm:$0xff] }
  0x57   :  { %815 = vmatpush1.bf16.msra.mxu0 %v814_v19  ;;  %v836_v19 = vpack.c.bf16 %v189_v12, %v185_v11  ;;  %v199_v28 = vld [vmem:[#allocation5 + $0x4b8] sm:$0xff]  ;;  %v966_v30 = vpack.c.bf16 %v190_v24, %v186_v22  ;;  %v194_v34 = vld [vmem:[#allocation5 + $0x490] sm:$0xff]  ;;  %v205_v38 = vld [vmem:[#allocation5 + $0x4e8] sm:$0xff] }
  0x58   :  { %943 = vmatpush1.bf16.msra.mxu1 %v942_v20  ;;  %817 = vmatprep.subr.bf16.mxu0 %v816_v21  ;;  %v184_v20 = vld [vmem:[#allocation5 + $0x440] sm:$0xff]  ;;  %v968_v35 = vpack.c.bf16 %v199_v28, %v195_v27  ;;  %v198_v36 = vld [vmem:[#allocation5 + $0x4b0] sm:$0xff]  ;;  %v203_v39 = vld [vmem:[#allocation5 + $0x4d8] sm:$0xff] }
  0x59   :  { %945 = vmatprep.subr.bf16.mxu1 %v944_v25  ;;  %v188_v21 = vld [vmem:[#allocation5 + $0x460] sm:$0xff]  ;;  %v193_v25 = vld [vmem:[#allocation5 + $0x488] sm:$0xff]  ;;  %v207_v40 = vld [vmem:[#allocation5 + $0x4f8] sm:$0xff]  ;;  %v970_v42 = vpack.c.bf16 %v198_v36, %v194_v34 }
  0x5a   :  { %v838_v29 = vpack.c.bf16 %v188_v21, %v184_v20  ;;  %v202_v46 = vld [vmem:[#allocation5 + $0x4d0] sm:$0xff]  ;;  %v972_v47 = vpack.c.bf16 %v207_v40, %v203_v39  ;;  %v213_v50 = vld [vmem:[#allocation5 + $0x528] sm:$0xff]  ;;  %v211_v51 = vld [vmem:[#allocation5 + $0x518] sm:$0xff] }
  0x5b   :  { %819 = vmatpush1.bf16.msra.mxu0 %v818_v31  ;;  %v840_v31 = vpack.c.bf16 %v197_v26, %v193_v25  ;;  %v206_v48 = vld [vmem:[#allocation5 + $0x4f0] sm:$0xff]  ;;  %v215_v52 = vld [vmem:[#allocation5 + $0x538] sm:$0xff]  ;;  %v221_v62 = vld [vmem:[#allocation5 + $0x568] sm:$0xff] }
  0x5c   :  { %947 = vmatpush1.bf16.msra.mxu1 %v946_v32  ;;  %821 = vmatprep.subr.bf16.mxu0 %v820_v33  ;;  %v192_v32 = vld [vmem:[#allocation5 + $0x480] sm:$0xff]  ;;  %v974_v54 = vpack.c.bf16 %v206_v48, %v202_v46  ;;  %v210_v58 = vld [vmem:[#allocation5 + $0x510] sm:$0xff]  ;;  %v976_v59 = vpack.c.bf16 %v215_v52, %v211_v51  ;;  %v219_v63 = vld [vmem:[#allocation5 + $0x558] sm:$0xff] }
  0x5d   :  { %949 = vmatprep.subr.bf16.mxu1 %v948_v37  ;;  %v196_v33 = vld [vmem:[#allocation5 + $0x4a0] sm:$0xff]  ;;  %v201_v37 = vld [vmem:[#allocation5 + $0x4c8] sm:$0xff]  ;;  %v214_v60 = vld [vmem:[#allocation5 + $0x530] sm:$0xff] }
  0x5e   :  { %v842_v41 = vpack.c.bf16 %v196_v33, %v192_v32  ;;  %v223_v0 = vld [vmem:[#allocation5 + $0x578] sm:$0xff]  ;;  %v978_v2 = vpack.c.bf16 %v214_v60, %v210_v58  ;;  %v218_v6 = vld [vmem:[#allocation5 + $0x550] sm:$0xff]  ;;  %v229_v10 = vld [vmem:[#allocation5 + $0x5a8] sm:$0xff] }
  0x5f   :  { %823 = vmatpush1.bf16.msra.mxu0 %v822_v43  ;;  %v844_v43 = vpack.c.bf16 %v205_v38, %v201_v37  ;;  %v980_v7 = vpack.c.bf16 %v223_v0, %v219_v63  ;;  %v222_v8 = vld [vmem:[#allocation5 + $0x570] sm:$0xff]  ;;  %v227_v11 = vld [vmem:[#allocation5 + $0x598] sm:$0xff]  ;;  %v224_v14 = vld [vmem:[#allocation5 + $0x580] sm:$0xff] }
  0x60   :  { %951 = vmatpush1.bf16.msra.mxu1 %v950_v44  ;;  %825 = vmatprep.subr.bf16.mxu0 %v824_v45  ;;  %v200_v44 = vld [vmem:[#allocation5 + $0x4c0] sm:$0xff]  ;;  %v231_v12 = vld [vmem:[#allocation5 + $0x5b8] sm:$0xff]  ;;  %v226_v20 = vld [vmem:[#allocation5 + $0x590] sm:$0xff] }
  0x61   :  { %953 = vmatprep.subr.bf16.mxu1 %v952_v49  ;;  %v204_v45 = vld [vmem:[#allocation5 + $0x4e0] sm:$0xff]  ;;  %v209_v49 = vld [vmem:[#allocation5 + $0x508] sm:$0xff]  ;;  %v230_v21 = vld [vmem:[#allocation5 + $0x5b0] sm:$0xff]  ;;  %v984_v22 = vpack.c.bf16 %v231_v12, %v227_v11 }
  0x62   :  { %v846_v53 = vpack.c.bf16 %v204_v45, %v200_v44  ;;  %v237_v24 = vld [vmem:[#allocation5 + $0x5e8] sm:$0xff]  ;;  %v1198_v25 = vld [vmem:[#allocation2 + $0x18] sm:$0xff]  ;;  %v236_v32 = vld [vmem:[#allocation5 + $0x5e0] sm:$0xff] }
  0x63   :  { %827 = vmatpush1.bf16.msra.mxu0 %v826_v55  ;;  %v848_v55 = vpack.c.bf16 %v213_v50, %v209_v49  ;;  %v235_v26 = vld [vmem:[#allocation5 + $0x5d8] sm:$0xff]  ;;  %v234_v33 = vld [vmem:[#allocation5 + $0x5d0] sm:$0xff]  ;;  %v241_v36 = vld [vmem:[#allocation5 + $0x608] sm:$0xff] }
  0x64   :  { %955 = vmatpush1.bf16.msra.mxu1 %v954_v56  ;;  %829 = vmatprep.subr.bf16.mxu0 %v828_v57  ;;  %v208_v56 = vld [vmem:[#allocation5 + $0x500] sm:$0xff]  ;;  %v239_v27 = vld [vmem:[#allocation5 + $0x5f8] sm:$0xff]  ;;  %v245_v37 = vld [vmem:[#allocation5 + $0x628] sm:$0xff] }
  0x65   :  { %957 = vmatprep.subr.bf16.mxu1 %v956_v61  ;;  %v212_v57 = vld [vmem:[#allocation5 + $0x520] sm:$0xff]  ;;  %v217_v61 = vld [vmem:[#allocation5 + $0x548] sm:$0xff]  ;;  %v988_v34 = vpack.c.bf16 %v239_v27, %v235_v26  ;;  %v243_v38 = vld [vmem:[#allocation5 + $0x618] sm:$0xff] }
  0x66   :  { %v850_v1 = vpack.c.bf16 %v212_v57, %v208_v56  ;;  %v247_v39 = vld [vmem:[#allocation5 + $0x638] sm:$0xff]  ;;  %v244_v44 = vld [vmem:[#allocation5 + $0x620] sm:$0xff]  ;;  %v242_v45 = vld [vmem:[#allocation5 + $0x610] sm:$0xff] }
  0x67   :  { %831 = vmatpush1.bf16.msra.mxu0 %v830_v3  ;;  %v852_v3 = vpack.c.bf16 %v221_v62, %v217_v61  ;;  %v992_v46 = vpack.c.bf16 %v247_v39, %v243_v38  ;;  %v249_v48 = vld [vmem:[#allocation5 + $0x648] sm:$0xff]  ;;  %v251_v50 = vld [vmem:[#allocation5 + $0x658] sm:$0xff]  ;;  %v252_v56 = vld [vmem:[#allocation5 + $0x660] sm:$0xff] }
  0x68   :  { %959 = vmatpush1.bf16.msra.mxu1 %v958_v4  ;;  %833 = vmatprep.subr.bf16.mxu0 %v832_v5  ;;  %v216_v4 = vld [vmem:[#allocation5 + $0x540] sm:$0xff]  ;;  %v253_v49 = vld [vmem:[#allocation5 + $0x668] sm:$0xff]  ;;  %v255_v51 = vld [vmem:[#allocation5 + $0x678] sm:$0xff] }
  0x69   :  { %961 = vmatprep.subr.bf16.mxu1 %v960_v9  ;;  %v220_v5 = vld [vmem:[#allocation5 + $0x560] sm:$0xff]  ;;  %v225_v9 = vld [vmem:[#allocation5 + $0x588] sm:$0xff]  ;;  %v250_v57 = vld [vmem:[#allocation5 + $0x650] sm:$0xff]  ;;  %v996_v58 = vpack.c.bf16 %v255_v51, %v251_v50 }
  0x6a   :  { %369 = vmatmul.mubr.f32.vlgmr.msra.gmra.mrb[0].mxu0 %v1194_v15  ;;  %v854_v13 = vpack.c.bf16 %v220_v5, %v216_v4  ;;  %v257_v60 = vld [vmem:[#allocation5 + $0x688] sm:$0xff]  ;;  %v259_v62 = vld [vmem:[#allocation5 + $0x698] sm:$0xff]  ;;  %v260_v4 = vld [vmem:[#allocation5 + $0x6a0] sm:$0xff] }
  0x6b   :  { %835 = vmatpush1.bf16.msra.mxu0 %v834_v17  ;;  %511 = vmatmul.mubr.f32.vlgmr.msra.gmra.mrb[0].mxu1 %v1194_v15  ;;  %v982_v17 = vpack.c.bf16 %v222_v8, %v218_v6  ;;  %v261_v61 = vld [vmem:[#allocation5 + $0x6a8] sm:$0xff]  ;;  %v263_v63 = vld [vmem:[#allocation5 + $0x6b8] sm:$0xff]  ;;  %v258_v5 = vld [vmem:[#allocation5 + $0x690] sm:$0xff] }
  0x6c   :  { %963 = vmatpush1.bf16.msra.mxu1 %v962_v18  ;;  %837 = vmatprep.subr.bf16.mxu0 %v836_v19  ;;  %v856_v18 = vpack.c.bf16 %v229_v10, %v225_v9  ;;  %v228_v19 = vld [vmem:[#allocation5 + $0x5a0] sm:$0xff]  ;;  %v1000_v6 = vpack.c.bf16 %v263_v63, %v259_v62  ;;  %v265_v8 = vld [vmem:[#allocation5 + $0x6c8] sm:$0xff]  ;;  %v267_v10 = vld [vmem:[#allocation5 + $0x6d8] sm:$0xff] }
  0x6d   :  { %965 = vmatprep.subr.bf16.mxu1 %v964_v23  ;;  %v233_v23 = vld [vmem:[#allocation5 + $0x5c8] sm:$0xff]  ;;  %439 = vmatprep.mubr.f32.mxu0 %v1198_v25  ;;  %v858_v28 = vpack.c.bf16 %v228_v19, %v224_v14  ;;  %v271_v11 = vld [vmem:[#allocation5 + $0x6f8] sm:$0xff]  ;;  %v266_v19 = vld [vmem:[#allocation5 + $0x6d0] sm:$0xff] }
  0x6e   :  { %581 = vmatprep.mubr.f32.mxu1 %v1198_v25  ;;  %v269_v9 = vld [vmem:[#allocation5 + $0x6e8] sm:$0xff]  ;;  %v279_v26 = vld [vmem:[#allocation5 + $0x738] sm:$0xff] }
  0x6f   :  { %839 = vmatpush1.bf16.msra.mxu0 %v838_v29  ;;  %v986_v29 = vpack.c.bf16 %v230_v21, %v226_v20  ;;  %v876_v14 = vpack.c.bf16 %v269_v9, %v265_v8  ;;  %v1004_v20 = vpack.c.bf16 %v271_v11, %v267_v10  ;;  %v270_v21 = vld [vmem:[#allocation5 + $0x6f0] sm:$0xff]  ;;  %v287_v38 = vld [vmem:[#allocation5 + $0x778] sm:$0xff] }
  0x70   :  { %967 = vmatpush1.bf16.msra.mxu1 %v966_v30  ;;  %841 = vmatprep.subr.bf16.mxu0 %v840_v31  ;;  %v860_v30 = vpack.c.bf16 %v237_v24, %v233_v23  ;;  %v232_v31 = vld [vmem:[#allocation5 + $0x5c0] sm:$0xff]  ;;  %v277_v23 = vld [vmem:[#allocation5 + $0x728] sm:$0xff]  ;;  %v275_v24 = vld [vmem:[#allocation5 + $0x718] sm:$0xff] }
  0x71   :  { %969 = vmatprep.subr.bf16.mxu1 %v968_v35  ;;  %v238_v35 = vld [vmem:[#allocation5 + $0x5f0] sm:$0xff]  ;;  %v862_v40 = vpack.c.bf16 %v236_v32, %v232_v31  ;;  %v276_v31 = vld [vmem:[#allocation5 + $0x720] sm:$0xff]  ;;  %v295_v50 = vld [vmem:[#allocation5 + $0x7b8] sm:$0xff] }
  0x72   :  { %v274_v32 = vld [vmem:[#allocation5 + $0x710] sm:$0xff]  ;;  %v303_v62 = vld [vmem:[#allocation5 + $0x7f8] sm:$0xff] }
  0x73   :  { %843 = vmatpush1.bf16.msra.mxu0 %v842_v41  ;;  %v990_v41 = vpack.c.bf16 %v238_v35, %v234_v33  ;;  %v1008_v33 = vpack.c.bf16 %v279_v26, %v275_v24  ;;  %v281_v35 = vld [vmem:[#allocation5 + $0x748] sm:$0xff]  ;;  %v1202_v9 = vld [vmem:[#allocation2 + $0x10] sm:$0xff] }
  0x74   :  { %971 = vmatpush1.bf16.msra.mxu1 %v970_v42  ;;  %845 = vmatprep.subr.bf16.mxu0 %v844_v43  ;;  %v864_v42 = vpack.c.bf16 %v245_v37, %v241_v36  ;;  %v240_v43 = vld [vmem:[#allocation5 + $0x600] sm:$0xff]  ;;  %v285_v36 = vld [vmem:[#allocation5 + $0x768] sm:$0xff]  ;;  %v283_v37 = vld [vmem:[#allocation5 + $0x758] sm:$0xff] }
  0x75   :  { %973 = vmatprep.subr.bf16.mxu1 %v972_v47  ;;  %v246_v47 = vld [vmem:[#allocation5 + $0x630] sm:$0xff]  ;;  %v866_v52 = vpack.c.bf16 %v244_v44, %v240_v43  ;;  %v284_v43 = vld [vmem:[#allocation5 + $0x760] sm:$0xff] }
  0x76   :  { %v282_v44 = vld [vmem:[#allocation5 + $0x750] sm:$0xff] }
  0x77   :  { %847 = vmatpush1.bf16.msra.mxu0 %v846_v53  ;;  %v994_v53 = vpack.c.bf16 %v246_v47, %v242_v45  ;;  %v1012_v45 = vpack.c.bf16 %v287_v38, %v283_v37  ;;  %v289_v47 = vld [vmem:[#allocation5 + $0x788] sm:$0xff] }
  0x78   :  { %975 = vmatpush1.bf16.msra.mxu1 %v974_v54  ;;  %849 = vmatprep.subr.bf16.mxu0 %v848_v55  ;;  %v868_v54 = vpack.c.bf16 %v253_v49, %v249_v48  ;;  %v248_v55 = vld [vmem:[#allocation5 + $0x640] sm:$0xff]  ;;  %v293_v48 = vld [vmem:[#allocation5 + $0x7a8] sm:$0xff]  ;;  %v291_v49 = vld [vmem:[#allocation5 + $0x798] sm:$0xff] }
  0x79   :  { %977 = vmatprep.subr.bf16.mxu1 %v976_v59  ;;  %v254_v59 = vld [vmem:[#allocation5 + $0x670] sm:$0xff]  ;;  %v870_v0 = vpack.c.bf16 %v252_v56, %v248_v55  ;;  %v292_v55 = vld [vmem:[#allocation5 + $0x7a0] sm:$0xff] }
  0x7a   :  { %v290_v56 = vld [vmem:[#allocation5 + $0x790] sm:$0xff] }
  0x7b   :  { %851 = vmatpush1.bf16.msra.mxu0 %v850_v1  ;;  %v998_v1 = vpack.c.bf16 %v254_v59, %v250_v57  ;;  %v1016_v57 = vpack.c.bf16 %v295_v50, %v291_v49  ;;  %v297_v59 = vld [vmem:[#allocation5 + $0x7c8] sm:$0xff] }
  0x7c   :  { %979 = vmatpush1.bf16.msra.mxu1 %v978_v2  ;;  %853 = vmatprep.subr.bf16.mxu0 %v852_v3  ;;  %v872_v2 = vpack.c.bf16 %v261_v61, %v257_v60  ;;  %v256_v3 = vld [vmem:[#allocation5 + $0x680] sm:$0xff]  ;;  %v301_v60 = vld [vmem:[#allocation5 + $0x7e8] sm:$0xff]  ;;  %v299_v61 = vld [vmem:[#allocation5 + $0x7d8] sm:$0xff] }
  0x7d   :  { %981 = vmatprep.subr.bf16.mxu1 %v980_v7  ;;  %v262_v7 = vld [vmem:[#allocation5 + $0x6b0] sm:$0xff]  ;;  %v874_v12 = vpack.c.bf16 %v260_v4, %v256_v3  ;;  %v300_v3 = vld [vmem:[#allocation5 + $0x7e0] sm:$0xff]  ;;  %v1020_v4 = vpack.c.bf16 %v303_v62, %v299_v61 }
  0x7f   :  { %855 = vmatpush1.bf16.msra.mxu0 %v854_v13  ;;  %v1002_v13 = vpack.c.bf16 %v262_v7, %v258_v5  ;;  %v298_v5 = vld [vmem:[#allocation5 + $0x7d0] sm:$0xff] }
  0x80   :  { %983 = vmatpush1.bf16.msra.mxu1 %v982_v17  ;;  %857 = vmatprep.subr.bf16.mxu0 %v856_v18  ;;  %v264_v17 = vld [vmem:[#allocation5 + $0x6c0] sm:$0xff] }
  0x81   :  { %985 = vmatprep.subr.bf16.mxu1 %v984_v22  ;;  %v268_v18 = vld [vmem:[#allocation5 + $0x6e0] sm:$0xff]  ;;  %v273_v22 = vld [vmem:[#allocation5 + $0x708] sm:$0xff] }
  0x82   :  { %v878_v27 = vpack.c.bf16 %v268_v18, %v264_v17 }
  0x83   :  { %859 = vmatpush1.bf16.msra.mxu0 %v858_v28  ;;  %v1006_v28 = vpack.c.bf16 %v270_v21, %v266_v19 }
  0x84   :  { %987 = vmatpush1.bf16.msra.mxu1 %v986_v29  ;;  %861 = vmatprep.subr.bf16.mxu0 %v860_v30  ;;  %v880_v29 = vpack.c.bf16 %v277_v23, %v273_v22  ;;  %v272_v30 = vld [vmem:[#allocation5 + $0x700] sm:$0xff] }
  0x85   :  { %989 = vmatprep.subr.bf16.mxu1 %v988_v34  ;;  %v278_v34 = vld [vmem:[#allocation5 + $0x730] sm:$0xff]  ;;  %v882_v39 = vpack.c.bf16 %v276_v31, %v272_v30 }
  0x87   :  { %863 = vmatpush1.bf16.msra.mxu0 %v862_v40  ;;  %v1010_v40 = vpack.c.bf16 %v278_v34, %v274_v32 }
  0x88   :  { %991 = vmatpush1.bf16.msra.mxu1 %v990_v41  ;;  %865 = vmatprep.subr.bf16.mxu0 %v864_v42  ;;  %v884_v41 = vpack.c.bf16 %v285_v36, %v281_v35  ;;  %v280_v42 = vld [vmem:[#allocation5 + $0x740] sm:$0xff] }
  0x89   :  { %993 = vmatprep.subr.bf16.mxu1 %v992_v46  ;;  %v286_v46 = vld [vmem:[#allocation5 + $0x770] sm:$0xff]  ;;  %v886_v51 = vpack.c.bf16 %v284_v43, %v280_v42 }
  0x8b   :  { %867 = vmatpush1.bf16.msra.mxu0 %v866_v52  ;;  %v1014_v52 = vpack.c.bf16 %v286_v46, %v282_v44 }
  0x8c   :  { %995 = vmatpush1.bf16.msra.mxu1 %v994_v53  ;;  %869 = vmatprep.subr.bf16.mxu0 %v868_v54  ;;  %v888_v53 = vpack.c.bf16 %v293_v48, %v289_v47  ;;  %v288_v54 = vld [vmem:[#allocation5 + $0x780] sm:$0xff] }
  0x8d   :  { %997 = vmatprep.subr.bf16.mxu1 %v996_v58  ;;  %v294_v58 = vld [vmem:[#allocation5 + $0x7b0] sm:$0xff]  ;;  %v890_v63 = vpack.c.bf16 %v292_v55, %v288_v54 }
  0x8f   :  { %871 = vmatpush1.bf16.msra.mxu0 %v870_v0  ;;  %v1018_v0 = vpack.c.bf16 %v294_v58, %v290_v56 }
  0x90   :  { %999 = vmatpush1.bf16.msra.mxu1 %v998_v1  ;;  %873 = vmatprep.subr.bf16.mxu0 %v872_v2  ;;  %v892_v1 = vpack.c.bf16 %v301_v60, %v297_v59  ;;  %v296_v2 = vld [vmem:[#allocation5 + $0x7c0] sm:$0xff] }
  0x91   :  { %1001 = vmatprep.subr.bf16.mxu1 %v1000_v6  ;;  %v302_v6 = vld [vmem:[#allocation5 + $0x7f0] sm:$0xff]  ;;  %v894_v7 = vpack.c.bf16 %v300_v3, %v296_v2 }
  0x92   :  { %v1022_v8 = vpack.c.bf16 %v302_v6, %v298_v5 }
  0x93   :  { %875 = vmatpush1.bf16.msra.mxu0 %v874_v12 }
  0x94   :  { %1003 = vmatpush1.bf16.msra.mxu1 %v1002_v13  ;;  %877 = vmatprep.subr.bf16.mxu0 %v876_v14 }
  0x95   :  { %1005 = vmatprep.subr.bf16.mxu1 %v1004_v20 }
  0x97   :  { %879 = vmatpush1.bf16.msra.mxu0 %v878_v27 }
  0x98   :  { %1007 = vmatpush1.bf16.msra.mxu1 %v1006_v28  ;;  %881 = vmatprep.subr.bf16.mxu0 %v880_v29 }
  0x99   :  { %1009 = vmatprep.subr.bf16.mxu1 %v1008_v33 }
  0x9b   :  { %883 = vmatpush1.bf16.msra.mxu0 %v882_v39 }
  0x9c   :  { %1011 = vmatpush1.bf16.msra.mxu1 %v1010_v40  ;;  %885 = vmatprep.subr.bf16.mxu0 %v884_v41 }
  0x9d   :  { %1013 = vmatprep.subr.bf16.mxu1 %v1012_v45 }
  0x9f   :  { %887 = vmatpush1.bf16.msra.mxu0 %v886_v51 }
  0xa0   :  { %1015 = vmatpush1.bf16.msra.mxu1 %v1014_v52  ;;  %889 = vmatprep.subr.bf16.mxu0 %v888_v53 }
  0xa1   :  { %1017 = vmatprep.subr.bf16.mxu1 %v1016_v57 }
  0xa3   :  { %891 = vmatpush1.bf16.msra.mxu0 %v890_v63 }
  0xa4   :  { %1019 = vmatpush1.bf16.msra.mxu1 %v1018_v0  ;;  %893 = vmatprep.subr.bf16.mxu0 %v892_v1 }
  0xa5   :  { %1021 = vmatprep.subr.bf16.mxu1 %v1020_v4 }
  0xa7   :  { %895 = vmatpush1.bf16.msra.mxu0 %v894_v7 }
  0xa8   :  { %1023 = vmatpush1.bf16.msra.mxu1 %v1022_v8 }
  0xaa   :  { %440 = vmatmul.mubr.f32.vlgmr.msra.gmra.mrb[0].mxu0 %v1202_v9 }
  0xab   :  { %582 = vmatmul.mubr.f32.vlgmr.msra.gmra.mrb[0].mxu1 %v1202_v9 }
 0x17d   :  { %v441_v10 = vpop.f32.mrb[0].mxu0 }
 0x17e   :  { %v590_v11 = vrot.slane %v441_v10, 4  ;;  %v583_v12 = vpop.f32.mrb[0].mxu1  ;;  %v443_v13 = vpop.f32.mrb[1].mxu0 }
 0x17f   :  { %v602_v14 = vrot.slane %v583_v12, 4  ;;  %v596_v17 = vrot.slane %v443_v13, 4  ;;  %v585_v18 = vpop.f32.mrb[1].mxu1 }
 0x180   :  { %v591_v19 = vadd.f32 %v590_v11, %v441_v10  ;;  %v608_v20 = vrot.slane %v585_v18, 4 }
 0x181   :  { %v603_v21 = vadd.f32 %v602_v14, %v583_v12  ;;  %v597_v22 = vadd.f32 %v596_v17, %v443_v13  ;;  %v667_v17 = vlaneseq }
 0x182   :  { %v592_v23 = vrot.slane %v591_v19, 2  ;;  %v609_v24 = vadd.f32 %v608_v20, %v585_v18 }
 0x183   :  { %v604_v26 = vrot.slane %v603_v21, 2  ;;  %v598_v27 = vrot.slane %v597_v22, 2 }
 0x184   :  { %v593_v28 = vadd.f32 %v592_v23, %v591_v19  ;;  %v610_v29 = vrot.slane %v609_v24, 2 }
 0x185   :  { %v605_v30 = vadd.f32 %v604_v26, %v603_v21  ;;  %v599_v31 = vadd.f32 %v598_v27, %v597_v22  ;;  %v668_v26 = vshrl.u32 %v667_v17, 7 }
 0x186   :  { %v594_v32 = vrot.slane %v593_v28, 1  ;;  %v611_v33 = vadd.f32 %v610_v29, %v609_v24 }
 0x187   :  { %v606_v34 = vrot.slane %v605_v30, 1  ;;  %v600_v35 = vrot.slane %v599_v31, 1  ;;  %v669_v27 = vsub.s32 0, %v668_v26  ;;  %v677_v29 = vsub.s32 2, %v668_v26 }
 0x188   :  { %v595_v36 = vadd.f32 %v594_v32, %v593_v28  ;;  %v612_v37 = vrot.slane %v611_v33, 1  ;;  %v588_v28 = vld [vmem:[%s1240_s2] sm:$0xf]  ;;  %v681_v32 = vsub.s32 3, %v668_v26  ;;  %s1133_s2 = smov [#allocation7]  }
 0x189   :  { %v607_v38 = vadd.f32 %v606_v34, %v605_v30  ;;  %v601_v39 = vadd.f32 %v600_v35, %v599_v31  ;;  %v673_v30 = vsub.s32 1, %v668_v26  ;;  %v589_v31 = vld [vmem:[%s1241_s3] sm:$0xf]  ;;  %v678_v35 = vrot.slane %v588_v28, %v677_v29  ;;  %s754_s3 = sshll.u32 %s1133_s2, 4  ;;  %s755_s3 = int_to_ptr.vmem [resolvable:$true] %s754_s3 }
 0x18a   :  { %v614_v40 = vmul.f32 0.125, %v595_v36  ;;  %v613_v41 = vadd.f32 %v612_v37, %v611_v33  ;;  %v670_v33 = vrot.slane %v588_v28, %v669_v27  ;;  %s1101_s17 = scalar_lea.vmem %s755_s3, 512  ;;  %p1106_p3 = scmp.lt.s32.totalorder %s755_s3, %s755_s3 }
 0x18b   :  { %v616_v42 = vmul.f32 0.125, %v607_v38  ;;  %v615_v43 = vmul.f32 0.125, %v601_v39  ;;  %v695_v38 = vrot.slane %v589_v31, %v669_v27  ;;  %v674_v39 = vrot.slane %v588_v28, %v673_v30  ;;  %p1102_p2 = scmp.ne.s32.totalorder %s755_s3, %s1101_s17  ;;  %p1107_p4 = scmp.lt.s32.totalorder %s1101_s17, %s1101_s17 }
 0x18c   :  { %v618_v44 = vsub.f32 %v441_v10, %v614_v40  ;;  %v617_v45 = vmul.f32 0.125, %v613_v41 }
 0x18d   :  { %v620_v46 = vsub.f32 %v583_v12, %v616_v42  ;;  %v1206_v47 = vsub.f32 %v443_v13, %v615_v43  ;;  %v703_v42 = vrot.slane %v589_v31, %v677_v29  ;;  %v682_v43 = vrot.slane %v588_v28, %v681_v32  ;;  %p1108_p5 = por %p1107_p4, %p1106_p3 }
 0x18e   :  { %v622_v48 = vmul.f32 %v618_v44, %v618_v44  ;;  %v1208_v49 = vsub.f32 %v585_v18, %v617_v45 }
 0x18f   :  { %v624_v50 = vmul.f32 %v620_v46, %v620_v46  ;;  %v623_v51 = vmul.f32 %v1206_v47, %v1206_v47  ;;  %p1109_p6 = pnand %p1108_p5, %p1102_p2 }
 0x190   :  { %v626_v52 = vrot.slane %v622_v48, 4  ;;  %v625_v53 = vmul.f32 %v1208_v49, %v1208_v49 }
 0x191   :  { %v638_v54 = vrot.slane %v624_v50, 4  ;;  %v632_v55 = vrot.slane %v623_v51, 4 }
 0x192   :  { %v627_v56 = vadd.f32 %v626_v52, %v622_v48  ;;  %v644_v57 = vrot.slane %v625_v53, 4 }
 0x193   :  { %v639_v58 = vadd.f32 %v638_v54, %v624_v50  ;;  %v633_v59 = vadd.f32 %v632_v55, %v623_v51  ;;  %v699_v51 = vrot.slane %v589_v31, %v673_v30  ;;  %v707_v54 = vrot.slane %v589_v31, %v681_v32 }
 0x194   :  { %v628_v60 = vrot.slane %v627_v56, 2  ;;  %v645_v61 = vadd.f32 %v644_v57, %v625_v53 }
 0x195   :  { %v640_v62 = vrot.slane %v639_v58, 2  ;;  %v634_v63 = vrot.slane %v633_v59, 2 }
 0x196   :  { %v629_v0 = vadd.f32 %v628_v60, %v627_v56  ;;  %v646_v1 = vrot.slane %v645_v61, 2 }
 0x197   :  { %v641_v2 = vadd.f32 %v640_v62, %v639_v58  ;;  %v635_v3 = vadd.f32 %v634_v63, %v633_v59 }
 0x198   :  { %v630_v4 = vrot.slane %v629_v0, 1  ;;  %v647_v5 = vadd.f32 %v646_v1, %v645_v61 }
 0x199   :  { %v642_v6 = vrot.slane %v641_v2, 1  ;;  %v636_v7 = vrot.slane %v635_v3, 1 }
 0x19a   :  { %v631_v8 = vadd.f32 %v630_v4, %v629_v0  ;;  %v648_v10 = vrot.slane %v647_v5, 1 }
 0x19b   :  { %v643_v11 = vadd.f32 %v642_v6, %v641_v2  ;;  %v637_v12 = vadd.f32 %v636_v7, %v635_v3 }
 0x19c   :  { %v650_v13 = vmul.f32 0.125, %v631_v8  ;;  %v649_v14 = vadd.f32 %v648_v10, %v647_v5 }
 0x19d   :  { %v652_v18 = vmul.f32 0.125, %v643_v11  ;;  %v651_v19 = vmul.f32 0.125, %v637_v12 }
 0x19e   :  { %v654_v20 = vadd.f32 1e-05, %v650_v13  ;;  %v653_v21 = vmul.f32 0.125, %v649_v14 }
 0x19f   :  { %v656_v22 = vadd.f32 1e-05, %v652_v18  ;;  %v655_v23 = vadd.f32 1e-05, %v651_v19 }
 0x1a0   :  { %1033 = vrsqrt.f32 %v654_v20  ;;  %v657_v24 = vadd.f32 1e-05, %v653_v21 }
 0x1a1   :  { %1035 = vrsqrt.f32 %v656_v22 }
 0x1a2   :  { %1037 = vrsqrt.f32 %v655_v23 }
 0x1a3   :  { %1039 = vrsqrt.f32 %v657_v24 }
 0x1aa   :  { %v1034_v34 = vpop.eup %1033 }
 0x1ab   :  { %v1036_v36 = vpop.eup %1035  ;;  %v662_v37 = vmul.f32 %v1034_v34, %v618_v44 }
 0x1ac   :  { %v1038_v40 = vpop.eup %1037  ;;  %v664_v41 = vmul.f32 %v1036_v36, %v620_v46 }
 0x1ad   :  { %v1040_v45 = vpop.eup %1039  ;;  %v687_v48 = vmul.f32 %v670_v33, %v662_v37  ;;  %v663_v50 = vmul.f32 %v1038_v40, %v1206_v47 }
 0x1ae   :  { %v689_v52 = vmul.f32 %v678_v35, %v664_v41  ;;  %v665_v53 = vmul.f32 %v1040_v45, %v1208_v49 }
 0x1af   :  { %v712_v55 = vadd.f32 %v695_v38, %v687_v48  ;;  %v688_v56 = vmul.f32 %v674_v39, %v663_v50 }
 0x1b0   :  { %v714_v57 = vadd.f32 %v703_v42, %v689_v52  ;;  %v690_v58 = vmul.f32 %v682_v43, %v665_v53 }
 0x1b1   :  { %v764_v44 = vmul.f32 -1.442695, %v712_v55  ;;  %v713_v59 = vadd.f32 %v699_v51, %v688_v56 }
 0x1b2   :  { %v766_v60 = vmul.f32 -1.442695, %v714_v57  ;;  %v715_v61 = vadd.f32 %v707_v54, %v690_v58 }
 0x1b3   :  { %1041 = vpow2.f32 %v764_v44  ;;  %v765_v46 = vmul.f32 -1.442695, %v713_v59 }
 0x1b4   :  { %1043 = vpow2.f32 %v766_v60  ;;  %v767_v62 = vmul.f32 -1.442695, %v715_v61 }
 0x1b5   :  { %1045 = vpow2.f32 %v765_v46 }
 0x1b6   :  { %1047 = vpow2.f32 %v767_v62 }
 0x1bd   :  { %v1042_v47 = vpop.eup %1041 }
 0x1be   :  { %v1044_v63 = vpop.eup %1043  ;;  %v728_v0 = vadd.f32 1.0, %v1042_v47 }
 0x1bf   :  { %v1046_v1 = vpop.eup %1045  ;;  %v730_v49 = vadd.f32 1.0, %v1044_v63 }
 0x1c0   :  { %v1048_v2 = vpop.eup %1047  ;;  %1049 = vrcp.f32 %v728_v0  ;;  %v729_v3 = vadd.f32 1.0, %v1046_v1 }
 0x1c1   :  { %1051 = vrcp.f32 %v730_v49  ;;  %v731_v4 = vadd.f32 1.0, %v1048_v2 }
 0x1c2   :  { %1053 = vrcp.f32 %v729_v3 }
 0x1c3   :  { %1055 = vrcp.f32 %v731_v4 }
 0x1ca   :  { %v1050_v5 = vpop.eup %1049 }
 0x1cb   :  { %v1052_v6 = vpop.eup %1051  ;;  %v740_v7 = vmul.f32 %v1050_v5, %v1194_v15 }
 0x1cc   :  { %v1054_v8 = vpop.eup %1053  ;;  %v742_v10 = vmul.f32 %v1052_v6, %v1202_v9 }
 0x1cd   :  { %v1056_v11 = vpop.eup %1055  ;;  %v741_v12 = vmul.f32 %v1054_v8, %v1190_v16  ;;  %744 = vst [vmem:[#allocation7] sm:$0xff] %v740_v7 }
 0x1ce   :  { %v743_v13 = vmul.f32 %v1056_v11, %v1198_v25  ;;  %746 = vst [vmem:[#allocation7 + $0x10] sm:$0xff] %v742_v10 }
 0x1cf   :  { %745 = vst [vmem:[#allocation7 + $0x8] sm:$0xff] %v741_v12 }
 0x1d0   :  { %747 = vst [vmem:[#allocation7 + $0x18] sm:$0xff] %v743_v13 }
 0x1d1   :  { %1112 = shalt.err (!%p1109_p6)
}
 0x1d2   :  { %s1113_s20 = scalar_lea.hbm %s1242_s4, 512 }
 0x1d3   :  { %p1114_p7 = scmp.ne.s32.totalorder %s1242_s4, %s1113_s20  ;;  %p1117_p8 = scmp.lt.u32.totalorder %s1113_s20, %s1242_s4 }
 0x1d5   :  { %p1119_p9 = pnand %p1117_p8, %p1114_p7 }
 0x1d7   :  { %1122 = shalt.err (!%p1119_p9)
}
 0x1d8   :  { %757 = dma.vmem_to_hbm [thread:$0]  %s755_s3, 512, %s1242_s4, [#allocation4]  }
 0x1d9   :  { %1127 = dma.done.wait [#allocation4], 512  }
 0x1da   :  { %1128 = vsyncadd [#allocation4], 4294966784 }
 0x1db   :  { %761 = vsyncpa [#allocation3], 1 }
 0x1dc   :  { %762 = vsyncpa [#allocation6], 1 }
 0x1dd   :  { %763 = vsyncpa [#allocation4], 1 }

</bundles_post_ra>
